<compile_context>
chip_gen: v7x
topology: tpu7x:2x2x1
jax: 0.10.0
libtpu: 0.0.40
codegen_flags: <defaults>
</compile_context>

<pallas_src>
import jax
import jax.numpy as jnp
from jax import lax
from jax.experimental import pallas as pl
from jax.experimental.pallas import tpu as pltpu


LANES = 128          # vreg lane width; also the flattened feature count here.
_NEG_BIG = -1e30     # finite "minus infinity" for padded logit lanes.


# -----------------------------------------------------------------------------
# Fused head kernel: x @ W1 + b1 -> ReLU -> @ W2p + b2p -> softmax (128-wide)
# -----------------------------------------------------------------------------
def _head_kernel(x_ref, w1_ref, b1_ref, w2_ref, b2_ref, o_ref):
    x = x_ref[...]                                             # (TB, 128) f32/bf16
    h = jnp.dot(x, w1_ref[...], preferred_element_type=jnp.float32)
    h = jnp.maximum(h + b1_ref[...], 0.0)                      # Linear + ReLU (f32)
    h = h.astype(w2_ref.dtype)
    z = jnp.dot(h, w2_ref[...], preferred_element_type=jnp.float32)
    z = z + b2_ref[...]                                        # (TB, 128); pads = -1e30
    z = z - jnp.max(z, axis=-1, keepdims=True)                 # stable softmax
    e = jnp.exp(z)                                             # padded lanes -> 0
    inv = pl.reciprocal(jnp.sum(e, axis=-1, keepdims=True), approx=True)  # EUP
    o_ref[...] = (e * inv).astype(o_ref.dtype)


def _round_up(x, m):
    return ((x + m - 1) // m) * m


def fused_head(feats, w1, b1, w2, b2, *, tb=4096, compute_dtype=jnp.bfloat16):
    """(B, 128) features -> (B, 4) softmax probabilities (f32)."""
    b, f_in = feats.shape
    h1 = w1.shape[1]
    n_out = w2.shape[1]

    # Lane-dense logits: zero-pad W2 columns, pad b2 with a large finite negative.
    w2p = jnp.zeros((h1, LANES), w2.dtype).at[:, :n_out].set(w2)
    b2p = jnp.full((LANES,), _NEG_BIG, jnp.float32).at[:n_out].set(b2.astype(jnp.float32))

    # bf16 (or f32) activation/weight stream; biases & accumulation stay f32.
    feats = feats.astype(compute_dtype)
    w1c = w1.astype(compute_dtype)
    w2c = w2p.astype(compute_dtype)
    b1c = b1.astype(jnp.float32).reshape(1, h1)
    b2c = b2p.reshape(1, LANES)

    # Pad rows only to the 8-sublane boundary (<= 7 rows) -- never to tb.
    bp = _round_up(b, 8)
    if bp != b:
        feats = jnp.pad(feats, ((0, bp - b), (0, 0)))

    # Row tile: as large as possible to amortize per-step overhead, but at
    # least two blocks (when rows allow) so ("parallel",) uses both v7x TCs.
    tb = max(8, min(tb, _round_up(pl.cdiv(bp, 2), 8)))
    grid = (pl.cdiv(bp, tb),)

    out = pl.pallas_call(
        _head_kernel,
        out_shape=jax.ShapeDtypeStruct((bp, LANES), jnp.float32),
        grid_spec=pltpu.PrefetchScalarGridSpec(
            num_scalar_prefetch=0,
            grid=grid,
            in_specs=[
                pl.BlockSpec((tb, f_in), lambda i: (i, 0)),      # activations
                pl.BlockSpec((f_in, h1), lambda i: (0, 0)),      # W1 (resident)
                pl.BlockSpec((1, h1), lambda i: (0, 0)),         # b1
                pl.BlockSpec((h1, LANES), lambda i: (0, 0)),     # W2 (lane-padded)
                pl.BlockSpec((1, LANES), lambda i: (0, 0)),      # b2 (lane-padded)
            ],
            out_specs=pl.BlockSpec((tb, LANES), lambda i: (i, 0)),
        ),
        compiler_params=pltpu.CompilerParams(
            dimension_semantics=("parallel",),   # row blocks shard across TCs (v7x)
        ),
    )(feats, w1c, b1c, w2c, b2c)
    return out[:b, :n_out]


# -----------------------------------------------------------------------------
# Conv / pool front-end (XLA native ops, NHWC; see TODO(synk) above)
# -----------------------------------------------------------------------------
def _conv_relu_nhwc(x, w_hwio, b, padding):
    out = lax.conv_general_dilated(
        x, w_hwio, window_strides=(1, 1),
        padding=[(padding, padding), (padding, padding)],
        dimension_numbers=("NHWC", "HWIO", "NHWC"))
    return jnp.maximum(out + b.reshape(1, 1, 1, -1), 0.0)


def _maxpool_3x3_s2_nhwc(x):
    return lax.reduce_window(
        x, -jnp.inf, lax.max,
        window_dimensions=(1, 3, 3, 1),
        window_strides=(1, 2, 2, 1),
        padding="VALID")


def _frontend(params, x, head_dtype=jnp.float32):
    # NCHW (PyTorch layout) -> NHWC once; all convs/pools stay NHWC (TPU-native).
    h = jnp.transpose(x, (0, 2, 3, 1))
    h = _conv_relu_nhwc(h, params["w_cv1"], params["b_cv1"], 0)
    h = _maxpool_3x3_s2_nhwc(h)
    h = _conv_relu_nhwc(h, params["w_cv2"], params["b_cv2"], 3)
    h = _maxpool_3x3_s2_nhwc(h)
    h = _conv_relu_nhwc(h, params["w_cv3a"], params["b_cv3a"], 2)
    h = _conv_relu_nhwc(h, params["w_cv3b"], params["b_cv3b"], 2)
    h = _conv_relu_nhwc(h, params["w_cv3c"], params["b_cv3c"], 2)
    h = _maxpool_3x3_s2_nhwc(h)
    # Back to NCHW just before flatten so the 128-feature ordering matches the
    # PyTorch spec (C,H,W order into l1); 8x4x4 per row -> negligible.
    h = jnp.transpose(h, (0, 3, 1, 2)).reshape(h.shape[0], -1)
    # Cast in the front-end epilogue (fuses with the pool under jit).
    return h.astype(head_dtype)


def cnn_forward(params, x, *, head_dtype=jnp.bfloat16):
    feats = _frontend(params, x, head_dtype)                   # (B, 128)
    return fused_head(feats, params["w_l1"], params["b_l1"],
                      params["w_l2"], params["b_l2"],
                      compute_dtype=head_dtype)


# -----------------------------------------------------------------------------
# Pure-JAX references
# -----------------------------------------------------------------------------
def _head_ref(feats, w1, b1, w2, b2, compute_dtype):
    f = feats.astype(compute_dtype)
    h = jnp.dot(f, w1.astype(compute_dtype),
                preferred_element_type=jnp.float32) + b1.astype(jnp.float32)
    h = jnp.maximum(h, 0.0).astype(compute_dtype)
    z = jnp.dot(h, w2.astype(compute_dtype),
                preferred_element_type=jnp.float32) + b2.astype(jnp.float32)
    return jax.nn.softmax(z, axis=-1)


def cnn_forward_ref(params, x, *, head_dtype=jnp.float32):
    feats = _frontend(params, x, jnp.float32)
    return _head_ref(feats, params["w_l1"], params["b_l1"],
                     params["w_l2"], params["b_l2"], head_dtype)


# -----------------------------------------------------------------------------
# Deterministic parameter init (PyTorch-style shapes; conv weights stored HWIO)
# -----------------------------------------------------------------------------
def init_params(key):
    ks = jax.random.split(key, 7)

    def conv(k, o, i, kh, kw):
        kw_, kb_ = jax.random.split(k)
        fan_in = i * kh * kw
        w = jax.random.normal(kw_, (o, i, kh, kw), jnp.float32) / jnp.sqrt(fan_in)
        b = jax.random.normal(kb_, (o,), jnp.float32) * 0.01
        return jnp.transpose(w, (2, 3, 1, 0)), b       # OIHW -> HWIO for NHWC conv

    def linear(k, i, o):
        kw_, kb_ = jax.random.split(k)
        w = jax.random.normal(kw_, (i, o), jnp.float32) / jnp.sqrt(i)
        b = jax.random.normal(kb_, (o,), jnp.float32) * 0.01
        return w, b

    p = {}
    p["w_cv1"], p["b_cv1"] = conv(ks[0], 4, 1, 10, 10)
    p["w_cv2"], p["b_cv2"] = conv(ks[1], 4, 4, 5, 5)
    p["w_cv3a"], p["b_cv3a"] = conv(ks[2], 8, 4, 3, 3)
    p["w_cv3b"], p["b_cv3b"] = conv(ks[3], 8, 8, 3, 3)
    p["w_cv3c"], p["b_cv3c"] = conv(ks[4], 8, 8, 3, 3)
    p["w_l1"], p["b_l1"] = linear(ks[5], 128, 64)
    p["w_l2"], p["b_l2"] = linear(ks[6], 64, 4)
    return p


if __name__ == "__main__":
    key = jax.random.PRNGKey(0)
    pkey, xkey = jax.random.split(key)
    params = init_params(pkey)

    # (B, C, H, W) = (2, 1, 24, 24): a 24x24 input makes the flatten produce
    # exactly 128 features, matching nn.Linear(128, 64) in the spec.
    x = jax.random.normal(xkey, (2, 1, 24, 24), dtype=jnp.float32)

    fwd_f32 = jax.jit(lambda p, xx: cnn_forward(p, xx, head_dtype=jnp.float32))
    fwd_bf16 = jax.jit(lambda p, xx: cnn_forward(p, xx, head_dtype=jnp.bfloat16))

    out_f32 = jax.block_until_ready(fwd_f32(params, x))
    out_bf16 = jax.block_until_ready(fwd_bf16(params, x))

    ref_f32 = jax.block_until_ready(cnn_forward_ref(params, x, head_dtype=jnp.float32))
    ref_bf16 = jax.block_until_ready(cnn_forward_ref(params, x, head_dtype=jnp.bfloat16))

    assert out_f32.shape == (2, 4), out_f32.shape
    assert out_bf16.shape == (2, 4), out_bf16.shape
    assert out_f32.dtype == jnp.float32
    assert out_bf16.dtype == jnp.float32

    # f32 head vs exact f32 reference: only the EUP approximate reciprocal differs.
    err_f32 = float(jnp.max(jnp.abs(out_f32 - ref_f32)))
    assert jnp.allclose(out_f32, ref_f32, atol=5e-3, rtol=5e-3), err_f32

    # bf16-streamed head vs a bf16-consistent reference (same casts).
    err_bf16 = float(jnp.max(jnp.abs(out_bf16 - ref_bf16)))
    assert jnp.allclose(out_bf16, ref_bf16, atol=5e-3, rtol=5e-3), err_bf16

    # Sanity: bf16 path stays close to the full-precision semantics.
    assert jnp.allclose(out_bf16, ref_f32, atol=1e-1), float(
        jnp.max(jnp.abs(out_bf16 - ref_f32)))

    # Softmax rows sum to ~1 (approx reciprocal allows a small deviation).
    assert jnp.allclose(jnp.sum(out_f32, axis=-1), 1.0, atol=1e-2)
    assert jnp.allclose(jnp.sum(out_bf16, axis=-1), 1.0, atol=1e-2)

    print("KERNEL_OK")
</pallas_src>

<mosaic_0001>
module attributes {stable_mosaic.version = 11 : i64} {
  func.func @_head_kernel(%arg0: i32, %arg1: memref<8x128xf32, #tpu.memory_space<vmem>>, %arg2: memref<128x64xf32, #tpu.memory_space<vmem>>, %arg3: memref<1x64xf32, #tpu.memory_space<vmem>>, %arg4: memref<64x128xf32, #tpu.memory_space<vmem>>, %arg5: memref<1x128xf32, #tpu.memory_space<vmem>>, %arg6: memref<8x128xf32, #tpu.memory_space<vmem>>) attributes {dimension_semantics = [#tpu.dimension_semantics<parallel>], iteration_bounds = array<i64: 1>, scalar_prefetch = 0 : i64, scratch_operands = 0 : i64, tpu.core_type = #tpu.core_type<tc>, window_params = [{transform_indices = @transform_0, window_bounds = array<i64: 8, 128>}, {pipeline_mode = #tpu.pipeline_mode<synchronous>, transform_indices = @transform_1, window_bounds = array<i64: 128, 64>}, {pipeline_mode = #tpu.pipeline_mode<synchronous>, transform_indices = @transform_2, window_bounds = array<i64: 1, 64>}, {pipeline_mode = #tpu.pipeline_mode<synchronous>, transform_indices = @transform_3, window_bounds = array<i64: 64, 128>}, {pipeline_mode = #tpu.pipeline_mode<synchronous>, transform_indices = @transform_4, window_bounds = array<i64: 1, 128>}, {transform_indices = @transform_5, window_bounds = array<i64: 8, 128>}]} {
    %c0 = arith.constant 0 : index
    %c0_0 = arith.constant 0 : index
    %0 = vector.load %arg1[%c0, %c0_0] : memref<8x128xf32, #tpu.memory_space<vmem>>, vector<8x128xf32>
    %c0_1 = arith.constant 0 : index
    %c0_2 = arith.constant 0 : index
    %1 = vector.load %arg2[%c0_1, %c0_2] : memref<128x64xf32, #tpu.memory_space<vmem>>, vector<128x64xf32>
    %cst = arith.constant dense<0.000000e+00> : vector<8x64xf32>
    %2 = tpu.matmul %0, %1, %cst {dimension_numbers = #tpu.dot_dimension_numbers<[1], [0], [0], [1], [0, 0, 1, 1], [], []>} : vector<8x128xf32>, vector<128x64xf32>, vector<8x64xf32> -> vector<8x64xf32>
    %c0_3 = arith.constant 0 : index
    %c0_4 = arith.constant 0 : index
    %3 = vector.load %arg3[%c0_3, %c0_4] : memref<1x64xf32, #tpu.memory_space<vmem>>, vector<1x64xf32>
    %4 = vector.broadcast %3 : vector<1x64xf32> to vector<8x64xf32>
    %5 = arith.addf %2, %4 : vector<8x64xf32>
    %cst_5 = arith.constant 0.000000e+00 : f32
    %6 = vector.broadcast %cst_5 : f32 to vector<8x64xf32>
    %7 = arith.maximumf %5, %6 : vector<8x64xf32>
    %c0_6 = arith.constant 0 : index
    %c0_7 = arith.constant 0 : index
    %8 = vector.load %arg4[%c0_6, %c0_7] : memref<64x128xf32, #tpu.memory_space<vmem>>, vector<64x128xf32>
    %cst_8 = arith.constant dense<0.000000e+00> : vector<8x128xf32>
    %9 = tpu.matmul %7, %8, %cst_8 {dimension_numbers = #tpu.dot_dimension_numbers<[1], [0], [0], [1], [0, 0, 1, 1], [], []>} : vector<8x64xf32>, vector<64x128xf32>, vector<8x128xf32> -> vector<8x128xf32>
    %c0_9 = arith.constant 0 : index
    %c0_10 = arith.constant 0 : index
    %10 = vector.load %arg5[%c0_9, %c0_10] : memref<1x128xf32, #tpu.memory_space<vmem>>, vector<1x128xf32>
    %11 = vector.broadcast %10 : vector<1x128xf32> to vector<8x128xf32>
    %12 = arith.addf %9, %11 : vector<8x128xf32>
    %cst_11 = arith.constant dense<0xFF800000> : vector<8xf32>
    %13 = vector.multi_reduction <maximumf>, %12, %cst_11 [1] : vector<8x128xf32> to vector<8xf32>
    %14 = vector.shape_cast %13 : vector<8xf32> to vector<8x1xf32>
    %15 = vector.broadcast %14 : vector<8x1xf32> to vector<8x128xf32>
    %16 = arith.subf %12, %15 : vector<8x128xf32>
    %17 = math.exp %16 : vector<8x128xf32>
    %cst_12 = arith.constant dense<0.000000e+00> : vector<8xf32>
    %18 = vector.multi_reduction <add>, %17, %cst_12 [1] : vector<8x128xf32> to vector<8xf32>
    %19 = vector.shape_cast %18 : vector<8xf32> to vector<8x1xf32>
    %20 = tpu.reciprocal %19 {approx = true} : vector<8x1xf32> -> vector<8x1xf32>
    %21 = vector.broadcast %20 : vector<8x1xf32> to vector<8x128xf32>
    %22 = arith.mulf %17, %21 : vector<8x128xf32>
    %c0_13 = arith.constant 0 : index
    %c0_14 = arith.constant 0 : index
    %23 = vector.load %arg6[%c0_13, %c0_14] : memref<8x128xf32, #tpu.memory_space<vmem>>, vector<8x128xf32>
    tpu.vector_store %arg6[%c0_13, %c0_14], %22 {strides = array<i32>} : memref<8x128xf32, #tpu.memory_space<vmem>>, vector<8x128xf32>,
    return
  }
  func.func @transform_0(%arg0: i32) -> (i32, i32) {
    %c0_i32 = arith.constant 0 : i32
    %c0_i32_0 = arith.constant 0 : i32
    return %arg0, %c0_i32 : i32, i32
  }
  func.func @transform_1(%arg0: i32) -> (i32, i32) {
    %c0_i32 = arith.constant 0 : i32
    %c0_i32_0 = arith.constant 0 : i32
    %c0_i32_1 = arith.constant 0 : i32
    return %c0_i32, %c0_i32_0 : i32, i32
  }
  func.func @transform_2(%arg0: i32) -> (i32, i32) {
    %c0_i32 = arith.constant 0 : i32
    %c0_i32_0 = arith.constant 0 : i32
    %c0_i32_1 = arith.constant 0 : i32
    return %c0_i32, %c0_i32_0 : i32, i32
  }
  func.func @transform_3(%arg0: i32) -> (i32, i32) {
    %c0_i32 = arith.constant 0 : i32
    %c0_i32_0 = arith.constant 0 : i32
    %c0_i32_1 = arith.constant 0 : i32
    return %c0_i32, %c0_i32_0 : i32, i32
  }
  func.func @transform_4(%arg0: i32) -> (i32, i32) {
    %c0_i32 = arith.constant 0 : i32
    %c0_i32_0 = arith.constant 0 : i32
    %c0_i32_1 = arith.constant 0 : i32
    return %c0_i32, %c0_i32_0 : i32, i32
  }
  func.func @transform_5(%arg0: i32) -> (i32, i32) {
    %c0_i32 = arith.constant 0 : i32
    %c0_i32_0 = arith.constant 0 : i32
    return %arg0, %c0_i32 : i32, i32
  }
}

</mosaic_0001>

<bundles_post_ra>
// kernel: _lambda_.1
= control target key start
LH: loop header
LB: loop body
LE: loop exit
PB: predicated region body
PF: predicated region fallthrough
CT: control target
= control target key end

     0   :  { %v344_v0 = vmov 0.0|0.0   ;;  %vm345_vm0 = vmmov 0   ;;  %v346_v4 = vmov 0.0   ;;  %vm130_vm1 = vcmask 523264   ;;  %s461_s1 = inlined_call_operand.vmem [shape: f32[128,64], index: 1, kind: input, shape index: {}]   ;;  %s462_s3 = inlined_call_operand.vmem [shape: f32[64,128], index: 3, kind: input, shape index: {}]   ;;  %s463_s0 = inlined_call_operand.vmem [shape: f32[8,128], index: 0, kind: input, shape index: {}]   ;;  %s464_s2 = inlined_call_operand.vmem [shape: f32[1,64], index: 2, kind: input, shape index: {}]   ;;  %s465_s4 = inlined_call_operand.vmem [shape: f32[1,128], index: 4, kind: input, shape index: {}]   ;;  %s466_s5 = inlined_call_operand.vmem [shape: f32[8,128], index: 5, kind: output, shape index: {}]  }
   0x1   :  { %301 = vmatprep.subr.bf16.mxu0 %v344_v0  ;;  %v21_v1 = vld [vmem:[%s461_s1] sm:$0xff]  ;;  %v22_v2 = vld [vmem:[%s461_s1 + $0x8] sm:$0xff]  ;;  %v23_v3 = vld [vmem:[%s461_s1 + $0x10] sm:$0xff]  ;;  %279 = vmatprep.mubr.msk.f32.mxu0 %vm345_vm0, %v346_v4 }
   0x2   :  { %v302_v5 = vpack.c.bf16 %v22_v2, %v21_v1  ;;  %v24_v6 = vld [vmem:[%s461_s1 + $0x18] sm:$0xff]  ;;  %325 = vmatprep.subr.bf16.mxu1 %v344_v0  ;;  %298 = vmatprep.mubr.msk.f32.mxu1 %vm345_vm0, %v346_v4  ;;  %v25_v8 = vld [vmem:[%s461_s1 + $0x20] sm:$0xff]  ;;  %v26_v9 = vld [vmem:[%s461_s1 + $0x28] sm:$0xff] }
   0x3   :  { %v305_v7 = vpack.c.bf16 %v24_v6, %v23_v3  ;;  %v115_v10 = vld [vmem:[%s462_s3] sm:$0xff]  ;;  %v116_v11 = vld [vmem:[%s462_s3 + $0x8] sm:$0xff]  ;;  %v117_v12 = vld [vmem:[%s462_s3 + $0x10] sm:$0xff]  ;;  %v308_v14 = vpack.c.bf16 %v26_v9, %v25_v8 }
   0x4   :  { %303 = vmatpush3.bf16.msra.mxu0 %v302_v5  ;;  %v118_v13 = vld [vmem:[%s462_s3 + $0x18] sm:$0xff]  ;;  %v326_v15 = vpack.c.bf16 %v116_v11, %v115_v10  ;;  %v27_v16 = vld [vmem:[%s461_s1 + $0x30] sm:$0xff]  ;;  %v119_v19 = vld [vmem:[%s462_s3 + $0x20] sm:$0xff] }
   0x5   :  { %304 = vmatprep.subr.bf16.mxu0 %v344_v0  ;;  %v28_v17 = vld [vmem:[%s461_s1 + $0x38] sm:$0xff]  ;;  %v329_v18 = vpack.c.bf16 %v118_v13, %v117_v12  ;;  %v120_v20 = vld [vmem:[%s462_s3 + $0x28] sm:$0xff]  ;;  %v29_v22 = vld [vmem:[%s461_s1 + $0x40] sm:$0xff] }
   0x6   :  { %327 = vmatpush3.bf16.msra.mxu1 %v326_v15  ;;  %v311_v21 = vpack.c.bf16 %v28_v17, %v27_v16  ;;  %v30_v23 = vld [vmem:[%s461_s1 + $0x48] sm:$0xff]  ;;  %v332_v24 = vpack.c.bf16 %v120_v20, %v119_v19  ;;  %v31_v26 = vld [vmem:[%s461_s1 + $0x50] sm:$0xff]  ;;  %v32_v27 = vld [vmem:[%s461_s1 + $0x58] sm:$0xff] }
   0x7   :  { %328 = vmatprep.subr.bf16.mxu1 %v344_v0  ;;  %v314_v25 = vpack.c.bf16 %v30_v23, %v29_v22  ;;  %v317_v28 = vpack.c.bf16 %v32_v27, %v31_v26  ;;  %v33_v29 = vld [vmem:[%s461_s1 + $0x60] sm:$0xff]  ;;  %v34_v30 = vld [vmem:[%s461_s1 + $0x68] sm:$0xff]  ;;  %v35_v32 = vld [vmem:[%s461_s1 + $0x70] sm:$0xff] }
   0x8   :  { %306 = vmatpush3.bf16.msra.mxu0 %v305_v7  ;;  %v320_v31 = vpack.c.bf16 %v34_v30, %v33_v29  ;;  %v36_v33 = vld [vmem:[%s461_s1 + $0x78] sm:$0xff]  ;;  %v20_v35 = vld [vmem:[%s463_s0] sm:$0xff]  ;;  %v121_v36 = vld [vmem:[%s462_s3 + $0x30] sm:$0xff] }
   0x9   :  { %307 = vmatprep.subr.bf16.mxu0 %v344_v0  ;;  %v323_v34 = vpack.c.bf16 %v36_v33, %v35_v32  ;;  %v122_v37 = vld [vmem:[%s462_s3 + $0x38] sm:$0xff]  ;;  %v218_v39 = vld [vmem:[%s464_s2] ss:$0 sm:$0xff] }
   0xa   :  { %330 = vmatpush3.bf16.msra.mxu1 %v329_v18  ;;  %v335_v38 = vpack.c.bf16 %v122_v37, %v121_v36  ;;  %v219_v44 = vld [vmem:[%s465_s4] ss:$0 sm:$0xff] }
   0xb   :  { %331 = vmatprep.subr.bf16.mxu1 %v344_v0 }
   0xc   :  { %309 = vmatpush3.bf16.msra.mxu0 %v308_v14 }
   0xd   :  { %310 = vmatprep.subr.bf16.mxu0 %v344_v0 }
   0xe   :  { %333 = vmatpush3.bf16.msra.mxu1 %v332_v24 }
   0xf   :  { %334 = vmatprep.subr.bf16.mxu1 %v344_v0 }
  0x10   :  { %312 = vmatpush3.bf16.msra.mxu0 %v311_v21 }
  0x11   :  { %313 = vmatprep.subr.bf16.mxu0 %v344_v0 }
  0x12   :  { %336 = vmatpush3.bf16.msra.mxu1 %v335_v38 }
  0x14   :  { %315 = vmatpush3.bf16.msra.mxu0 %v314_v25 }
  0x15   :  { %316 = vmatprep.subr.bf16.mxu0 %v344_v0 }
  0x18   :  { %318 = vmatpush3.bf16.msra.mxu0 %v317_v28 }
  0x19   :  { %319 = vmatprep.subr.bf16.mxu0 %v344_v0 }
  0x1c   :  { %321 = vmatpush3.bf16.msra.mxu0 %v320_v31 }
  0x1d   :  { %322 = vmatprep.subr.bf16.mxu0 %v344_v0 }
  0x20   :  { %324 = vmatpush3.bf16.msra.mxu0 %v323_v34 }
  0x23   :  { %280 = vmatmul.mubr.f32.vlgmr.msra.gmra.mrb[0].mxu0 %v20_v35 }
  0xf6   :  { %v110_v40 = vpop.f32.mrb[0].mxu0 }
  0xf7   :  { %v111_v41 = vadd.f32 %v218_v39, %v110_v40  ;;  %v281_v42 = vpop.f32.mrb[1].mxu0 }
  0xf9   :  { %v114_v43 = vmax.f32 %v111_v41, 0.0 }
  0xfb   :  { %299 = vmatmul.mubr.msk.f32.vlgmr.msra.gmra.mrb[0].mxu1 %vm130_vm1, %v114_v43 }
 0x1ce   :  { %v200_v45 = vpop.f32.mrb[0].mxu1 }
 0x1cf   :  { %v201_v46 = vadd.f32 %v219_v44, %v200_v45  ;;  %v300_v47 = vpop.f32.mrb[1].mxu1 }
 0x1d1   :  { %204 = vmax.xlane.f32.xlu0 %v201_v46 }
 0x25e   :  { %v205_v48 = vpop.xlane.xlu0 %204 }
 0x25f   :  { %v206_v49 = vsub.f32 %v201_v46, %v205_v48 }
 0x261   :  { %v207_v50 = vmul.f32 1.442695, %v206_v49 }
 0x263   :  { %340 = vpow2.f32 %v207_v50 }
 0x26d   :  { %v341_v51 = vpop.eup %340 }
 0x26e   :  { %209 = vadd.xlane.f32.xlu0 %v341_v51 }
 0x2fb   :  { %v210_v52 = vpop.xlane.xlu0 %209 }
 0x2fc   :  { %342 = vrcp.f32 %v210_v52 }
 0x306   :  { %v343_v53 = vpop.eup %342 }
 0x307   :  { %v212_v54 = vmul.f32 %v343_v53, %v341_v51 }
 0x309   :  { %213 = vst [vmem:[%s466_s5] sm:$0xff] %v212_v54 }

</bundles_post_ra>
